<compile_context>
chip_gen: v7x
topology: tpu7x:2x2x1
jax: 0.10.0
libtpu: 0.0.40
codegen_flags: <defaults>
</compile_context>

<pallas_src>
import jax
import jax.numpy as jnp
from jax.experimental import pallas as pl
from jax.experimental.pallas import tpu as pltpu


_OUT_TILE = (8, 128)          # lane-dense, (8,128)-aligned output tile
_MAX_BLOCK_BYTES = 4 << 20    # per-input, per-buffer block-size cap


def _round_up(x, m):
    return ((x + m - 1) // m) * m


def _tile_rows_cap():
    """Per-generation row-tile cap (v5e scoped VMEM is the tight one)."""
    try:
        kind = jax.devices()[0].device_kind.lower()
    except Exception:
        kind = ""
    return 1024 if "v5" in kind else 2048


def _as_2d(x):
    """Free (contiguous) reshape to a 2-D slab, lane-dense when possible."""
    total = x.size
    for lane in (512, 256, 128):
        if total % lane == 0:
            return x.reshape(total // lane, lane)
    if x.ndim >= 2:
        return x.reshape(-1, x.shape[-1])
    return x.reshape(total, 1)


# --------------------------- in-kernel CE helper -----------------------------

def _ce_scalar(logits_ref, labels_ref):
    """Mean cross-entropy over the batch (f32 scalar).

    TODO(synk): PyTorch CrossEntropyLoss ignore_index / out-of-range-label
    semantics are not reproduced; out-of-range labels contribute `lse`.
    TODO(synk): large-vocab heads should tile the class dim with an online
    max/LSE instead of this single full-block form.
    """
    logits = logits_ref[...].astype(jnp.float32)          # (N, C)
    labels = labels_ref[...]                               # (N, 1) int32
    n, c = logits.shape
    m = jnp.max(logits, axis=-1, keepdims=True)
    lse = m + jnp.log(jnp.sum(jnp.exp(logits - m), axis=-1, keepdims=True))
    class_ids = jax.lax.broadcasted_iota(jnp.int32, (n, c), 1)
    onehot = (class_ids == labels).astype(jnp.float32)
    picked = jnp.sum(logits * onehot, axis=-1, keepdims=True)
    return jnp.sum(lse - picked) / jnp.float32(n)


# --------------------------- CE-only kernel ----------------------------------

def _ce_only_kernel(logits_ref, labels_ref, out_ref):
    out_ref[...] = jnp.full(out_ref.shape,
                            _ce_scalar(logits_ref, labels_ref),
                            dtype=jnp.float32)


def _cross_entropy(logits, labels2d):
    out = pl.pallas_call(
        _ce_only_kernel,
        out_shape=jax.ShapeDtypeStruct(_OUT_TILE, jnp.float32),
        in_specs=[pl.BlockSpec(memory_space=pltpu.VMEM),
                  pl.BlockSpec(memory_space=pltpu.VMEM)],
        out_specs=pl.BlockSpec(memory_space=pltpu.VMEM),
    )(logits, labels2d)
    return out[0, 0]


# --------------------------- fused CE + MSE kernel ----------------------------

def _make_fused_kernel(rows, tr, n_inner, need_mask):
    def kernel(d_ref, c_ref, logits_ref, labels_ref, out_ref, acc_ref):
        j = pl.program_id(1)

        @pl.when(j == 0)
        def _init():
            acc_ref[...] = jnp.zeros_like(acc_ref)

        diff = d_ref[...].astype(jnp.float32) - c_ref[...].astype(jnp.float32)
        if need_mask:
            row0 = (pl.program_id(0) * n_inner + j) * tr
            rid = jax.lax.broadcasted_iota(jnp.int32, diff.shape, 0) + row0
            diff = jnp.where(rid < rows, diff, 0.0)
        acc_ref[...] += jnp.sum(diff * diff, axis=(0, 1), keepdims=True)

        @pl.when(j == n_inner - 1)
        def _finalize():
            # CE is tiny; recomputing it per outer index keeps each core's
            # output tile self-contained (no cross-core shared output block).
            ce = _ce_scalar(logits_ref, labels_ref)
            mse_sum = acc_ref[0, 0]
            sub_iota = jax.lax.broadcasted_iota(jnp.int32, _OUT_TILE, 0)
            out_ref[0] = jnp.where(sub_iota == 1, ce, mse_sum)

    return kernel


def _fused_ce_mse(logits, labels2d, denoised, clean):
    total = denoised.size
    d2 = _as_2d(denoised)
    c2 = _as_2d(clean)
    rows, lane = d2.shape

    itemsize = max(jnp.dtype(d2.dtype).itemsize, jnp.dtype(c2.dtype).itemsize)
    sub = max(8, 32 // itemsize)                 # sublane packing unit per dtype
    cap = _tile_rows_cap()
    cap = min(cap, max(sub, (_MAX_BLOCK_BYTES // (lane * itemsize)) // sub * sub))

    if rows >= 2 * sub:
        # At least 2 blocks so the "parallel" axis can shard across v7x's 2 TCs.
        tr = min(cap, _round_up(-(-rows // 2), sub))
    else:
        tr = rows                                # single full-extent block

    n_blocks = -(-rows // tr)
    n_par = 2 if n_blocks >= 2 else 1
    n_inner = -(-n_blocks // n_par)
    clamp = (n_par * n_inner != n_blocks)
    need_mask = (n_par * n_inner * tr != rows)

    def data_im(i, j):
        b = i * n_inner + j
        if clamp:
            b = jnp.minimum(b, n_blocks - 1)     # extra block is fully masked
        return (b, 0)

    blk_bytes = tr * lane * itemsize
    vmem_limit = int(min(max(4 * blk_bytes + (8 << 20), 16 << 20), 96 << 20))

    out = pl.pallas_call(
        _make_fused_kernel(rows, tr, n_inner, need_mask),
        out_shape=jax.ShapeDtypeStruct((n_par,) + _OUT_TILE, jnp.float32),
        grid=(n_par, n_inner),
        in_specs=[
            pl.BlockSpec((tr, lane), data_im),
            pl.BlockSpec((tr, lane), data_im),
            pl.BlockSpec(logits.shape, lambda i, j: (0, 0)),
            pl.BlockSpec(labels2d.shape, lambda i, j: (0, 0)),
        ],
        out_specs=pl.BlockSpec((1,) + _OUT_TILE, lambda i, j: (i, 0, 0)),
        scratch_shapes=[pltpu.VMEM((1, 1), jnp.float32)],
        compiler_params=pltpu.CompilerParams(
            dimension_semantics=("parallel", "arbitrary"),
            vmem_limit_bytes=vmem_limit),
    )(d2, c2, logits, labels2d)

    ce = out[0, 1, 0]
    mse = jnp.sum(out[:, 0, 0]) / jnp.float32(total)
    return ce, mse


# --------------------------- public wrapper ----------------------------------

def multi_task_loss(logits, labels, denoised=None, clean_input=None, alpha=1.0):
    """JAX/Pallas equivalent of MultiTaskLoss.forward (returns a scalar)."""
    labels2d = labels.astype(jnp.int32).reshape(-1, 1)
    if denoised is None or clean_input is None or denoised.size == 0:
        # TODO(synk): torch MSELoss on empty tensors returns nan; skipped here.
        return _cross_entropy(logits, labels2d)
    ce, mse = _fused_ce_mse(logits, labels2d, denoised, clean_input)
    return ce + alpha * mse


# --------------------------- reference & test --------------------------------

def _reference(logits, labels, denoised, clean, alpha):
    logp = jax.nn.log_softmax(logits.astype(jnp.float32), axis=-1)
    ce = -jnp.mean(jnp.take_along_axis(
        logp, labels[:, None].astype(jnp.int32), axis=-1))
    mse = jnp.mean((denoised.astype(jnp.float32) - clean.astype(jnp.float32)) ** 2)
    return ce + alpha * mse


if __name__ == "__main__":
    key = jax.random.PRNGKey(0)
    k1, k2, k3, k4, k5, k6 = jax.random.split(key, 6)

    N, C = 8, 32                 # classification: batch x num_classes
    B, CH, H, W = 2, 4, 16, 16   # reconstruction: NCHW

    logits = jax.random.normal(k1, (N, C), dtype=jnp.float32)
    labels = jax.random.randint(k2, (N,), 0, C, dtype=jnp.int32)
    denoised = jax.random.normal(k3, (B, CH, H, W), dtype=jnp.float32)
    clean = jax.random.normal(k4, (B, CH, H, W), dtype=jnp.float32)

    alpha = 0.5
    loss = jax.block_until_ready(
        multi_task_loss(logits, labels, denoised, clean, alpha=alpha))
    ref = _reference(logits, labels, denoised, clean, alpha)
    assert jnp.allclose(loss, ref, rtol=1e-4, atol=1e-5), (loss, ref)

    # CE-only path (denoised/clean omitted).
    ce_only = jax.block_until_ready(multi_task_loss(logits, labels))
    ce_ref = _reference(logits, labels, jnp.zeros((1,)), jnp.zeros((1,)), 0.0)
    assert jnp.allclose(ce_only, ce_ref, rtol=1e-4, atol=1e-5), (ce_only, ce_ref)

    # Odd-shaped reconstruction: exercises the no-pad ragged/mask path.
    den_odd = jax.random.normal(k5, (2, 3, 7, 9), dtype=jnp.float32)
    cln_odd = jax.random.normal(k6, (2, 3, 7, 9), dtype=jnp.float32)
    loss_odd = jax.block_until_ready(
        multi_task_loss(logits, labels, den_odd, cln_odd, alpha=1.0))
    ref_odd = _reference(logits, labels, den_odd, cln_odd, 1.0)
    assert jnp.allclose(loss_odd, ref_odd, rtol=1e-4, atol=1e-5), (loss_odd, ref_odd)

    # bf16 reconstruction streams in bf16 (halved HBM read traffic).
    den_bf = denoised.astype(jnp.bfloat16)
    cln_bf = clean.astype(jnp.bfloat16)
    loss_bf = jax.block_until_ready(
        multi_task_loss(logits, labels, den_bf, cln_bf, alpha=alpha))
    ref_bf = _reference(logits, labels, den_bf, cln_bf, alpha)
    assert jnp.allclose(loss_bf, ref_bf, rtol=1e-4, atol=1e-4), (loss_bf, ref_bf)

    print("KERNEL_OK")
</pallas_src>

<mosaic_0001>
module attributes {stable_mosaic.version = 11 : i64} {
  func.func @kernel(%arg0: i32, %arg1: i32, %arg2: memref<4x512xf32, #tpu.memory_space<vmem>>, %arg3: memref<4x512xf32, #tpu.memory_space<vmem>>, %arg4: memref<8x32xf32, #tpu.memory_space<vmem>>, %arg5: memref<8x1xi32, #tpu.memory_space<vmem>>, %arg6: memref<1x8x128xf32, #tpu.memory_space<vmem>>, %arg7: memref<1x1xf32, #tpu.memory_space<vmem>>) attributes {dimension_semantics = [#tpu.dimension_semantics<parallel>, #tpu.dimension_semantics<arbitrary>], iteration_bounds = array<i64: 1, 1>, scalar_prefetch = 0 : i64, scratch_operands = 1 : i64, tpu.core_type = #tpu.core_type<tc>, window_params = [{transform_indices = @transform_0, window_bounds = array<i64: 4, 512>}, {transform_indices = @transform_1, window_bounds = array<i64: 4, 512>}, {pipeline_mode = #tpu.pipeline_mode<synchronous>, transform_indices = @transform_2, window_bounds = array<i64: 8, 32>}, {pipeline_mode = #tpu.pipeline_mode<synchronous>, transform_indices = @transform_3, window_bounds = array<i64: 8, 1>}, {transform_indices = @transform_4, window_bounds = array<i64: 1, 8, 128>}]} {
    %c0_i32 = arith.constant 0 : i32
    %0 = arith.cmpi eq, %arg1, %c0_i32 : i32
    %1 = arith.extui %0 : i1 to i32
    %c0_i32_0 = arith.constant 0 : i32
    %2 = arith.cmpi ne, %1, %c0_i32_0 : i32
    scf.if %2 {
      %cst_10 = arith.constant 0.000000e+00 : f32
      %18 = vector.broadcast %cst_10 : f32 to vector<1x1xf32>
      %c0_11 = arith.constant 0 : index
      %c0_12 = arith.constant 0 : index
      %19 = vector.load %arg7[%c0_11, %c0_12] : memref<1x1xf32, #tpu.memory_space<vmem>>, vector<1x1xf32>
      tpu.vector_store %arg7[%c0_11, %c0_12], %18 {strides = array<i32>} : memref<1x1xf32, #tpu.memory_space<vmem>>, vector<1x1xf32>,
    } else {
    }
    %c0 = arith.constant 0 : index
    %c0_1 = arith.constant 0 : index
    %3 = vector.load %arg2[%c0, %c0_1] : memref<4x512xf32, #tpu.memory_space<vmem>>, vector<4x512xf32>
    %c0_2 = arith.constant 0 : index
    %c0_3 = arith.constant 0 : index
    %4 = vector.load %arg3[%c0_2, %c0_3] : memref<4x512xf32, #tpu.memory_space<vmem>>, vector<4x512xf32>
    %5 = arith.subf %3, %4 : vector<4x512xf32>
    %c0_4 = arith.constant 0 : index
    %c0_5 = arith.constant 0 : index
    %6 = vector.load %arg7[%c0_4, %c0_5] : memref<1x1xf32, #tpu.memory_space<vmem>>, vector<1x1xf32>
    %7 = arith.mulf %5, %5 : vector<4x512xf32>
    %8 = vector.shape_cast %7 : vector<4x512xf32> to vector<1x4x512xf32>
    %cst = arith.constant dense<0.000000e+00> : vector<1xf32>
    %9 = vector.multi_reduction <add>, %8, %cst [1, 2] : vector<1x4x512xf32> to vector<1xf32>
    %10 = vector.shape_cast %9 : vector<1xf32> to vector<1x1x1xf32>
    %11 = vector.extract %10[0, 0, 0] : f32 from vector<1x1x1xf32>
    %12 = vector.broadcast %11 : f32 to vector<1x1xf32>
    %13 = arith.addf %6, %12 : vector<1x1xf32>
    %c0_6 = arith.constant 0 : index
    %c0_7 = arith.constant 0 : index
    %14 = vector.load %arg7[%c0_6, %c0_7] : memref<1x1xf32, #tpu.memory_space<vmem>>, vector<1x1xf32>
    tpu.vector_store %arg7[%c0_6, %c0_7], %13 {strides = array<i32>} : memref<1x1xf32, #tpu.memory_space<vmem>>, vector<1x1xf32>,
    %c0_i32_8 = arith.constant 0 : i32
    %15 = arith.cmpi eq, %arg1, %c0_i32_8 : i32
    %16 = arith.extui %15 : i1 to i32
    %c0_i32_9 = arith.constant 0 : i32
    %17 = arith.cmpi ne, %16, %c0_i32_9 : i32
    scf.if %17 {
      %c0_10 = arith.constant 0 : index
      %c0_11 = arith.constant 0 : index
      %18 = vector.load %arg4[%c0_10, %c0_11] : memref<8x32xf32, #tpu.memory_space<vmem>>, vector<8x32xf32>
      %c0_12 = arith.constant 0 : index
      %c0_13 = arith.constant 0 : index
      %19 = vector.load %arg5[%c0_12, %c0_13] : memref<8x1xi32, #tpu.memory_space<vmem>>, vector<8x1xi32>
      %cst_14 = arith.constant dense<0xFF800000> : vector<8xf32>
      %20 = vector.multi_reduction <maximumf>, %18, %cst_14 [1] : vector<8x32xf32> to vector<8xf32>
      %21 = vector.shape_cast %20 : vector<8xf32> to vector<8x1xf32>
      %22 = vector.broadcast %21 : vector<8x1xf32> to vector<8x32xf32>
      %23 = arith.subf %18, %22 : vector<8x32xf32>
      %24 = math.exp %23 : vector<8x32xf32>
      %cst_15 = arith.constant dense<0.000000e+00> : vector<8xf32>
      %25 = vector.multi_reduction <add>, %24, %cst_15 [1] : vector<8x32xf32> to vector<8xf32>
      %26 = vector.shape_cast %25 : vector<8xf32> to vector<8x1xf32>
      %27 = math.log %26 : vector<8x1xf32>
      %28 = arith.addf %21, %27 : vector<8x1xf32>
      %29 = tpu.iota {dimensions = array<i32: 1>} : vector<8x32xi32>
      %30 = vector.broadcast %19 : vector<8x1xi32> to vector<8x32xi32>
      %31 = arith.cmpi eq, %29, %30 : vector<8x32xi32>
      %32 = arith.extui %31 : vector<8x32xi1> to vector<8x32xi32>
      %33 = arith.sitofp %32 : vector<8x32xi32> to vector<8x32xf32>
      %34 = arith.mulf %18, %33 : vector<8x32xf32>
      %cst_16 = arith.constant dense<0.000000e+00> : vector<8xf32>
      %35 = vector.multi_reduction <add>, %34, %cst_16 [1] : vector<8x32xf32> to vector<8xf32>
      %36 = vector.shape_cast %35 : vector<8xf32> to vector<8x1xf32>
      %37 = arith.subf %28, %36 : vector<8x1xf32>
      %38 = vector.shape_cast %37 : vector<8x1xf32> to vector<1x8x1xf32>
      %cst_17 = arith.constant dense<0.000000e+00> : vector<1xf32>
      %39 = vector.multi_reduction <add>, %38, %cst_17 [1, 2] : vector<1x8x1xf32> to vector<1xf32>
      %40 = vector.shape_cast %39 : vector<1xf32> to vector<1x1x1xf32>
      %41 = vector.extract %40[0, 0, 0] : f32 from vector<1x1x1xf32>
      %cst_18 = arith.constant 8.000000e+00 : f32
      %42 = arith.divf %41, %cst_18 : f32
      %c0_19 = arith.constant 0 : index
      %c0_20 = arith.constant 0 : index
      %43 = vector.load %arg7[%c0_19, %c0_20] : memref<1x1xf32, #tpu.memory_space<vmem>>, vector<1x1xf32>
      %44 = vector.extract %43[0, 0] : f32 from vector<1x1xf32>
      %45 = tpu.iota {dimensions = array<i32: 0>} : vector<8x128xi32>
      %c1_i32 = arith.constant 1 : i32
      %46 = vector.broadcast %c1_i32 : i32 to vector<8x128xi32>
      %47 = arith.cmpi eq, %45, %46 : vector<8x128xi32>
      %48 = vector.broadcast %42 : f32 to vector<8x128xf32>
      %49 = vector.broadcast %44 : f32 to vector<8x128xf32>
      %50 = arith.select %47, %48, %49 : vector<8x128xi1>, vector<8x128xf32>
      %c0_21 = arith.constant 0 : index
      %c0_22 = arith.constant 0 : index
      %c0_23 = arith.constant 0 : index
      %51 = vector.load %arg6[%c0_21, %c0_22, %c0_23] : memref<1x8x128xf32, #tpu.memory_space<vmem>>, vector<1x8x128xf32>
      %52 = vector.shape_cast %51 : vector<1x8x128xf32> to vector<8x128xf32>
      %53 = vector.shape_cast %50 : vector<8x128xf32> to vector<1x8x128xf32>
      tpu.vector_store %arg6[%c0_21, %c0_22, %c0_23], %53 {strides = array<i32>} : memref<1x8x128xf32, #tpu.memory_space<vmem>>, vector<1x8x128xf32>,
    } else {
    }
    return
  }
  func.func @transform_0(%arg0: i32, %arg1: i32) -> (i32, i32) {
    %c1_i32 = arith.constant 1 : i32
    %0 = arith.muli %arg0, %c1_i32 : i32
    %1 = arith.addi %0, %arg1 : i32
    %c0_i32 = arith.constant 0 : i32
    %c0_i32_0 = arith.constant 0 : i32
    return %1, %c0_i32 : i32, i32
  }
  func.func @transform_1(%arg0: i32, %arg1: i32) -> (i32, i32) {
    %c1_i32 = arith.constant 1 : i32
    %0 = arith.muli %arg0, %c1_i32 : i32
    %1 = arith.addi %0, %arg1 : i32
    %c0_i32 = arith.constant 0 : i32
    %c0_i32_0 = arith.constant 0 : i32
    return %1, %c0_i32 : i32, i32
  }
  func.func @transform_2(%arg0: i32, %arg1: i32) -> (i32, i32) {
    %c0_i32 = arith.constant 0 : i32
    %c0_i32_0 = arith.constant 0 : i32
    %c0_i32_1 = arith.constant 0 : i32
    return %c0_i32, %c0_i32_0 : i32, i32
  }
  func.func @transform_3(%arg0: i32, %arg1: i32) -> (i32, i32) {
    %c0_i32 = arith.constant 0 : i32
    %c0_i32_0 = arith.constant 0 : i32
    %c0_i32_1 = arith.constant 0 : i32
    return %c0_i32, %c0_i32_0 : i32, i32
  }
  func.func @transform_4(%arg0: i32, %arg1: i32) -> (i32, i32, i32) {
    %c0_i32 = arith.constant 0 : i32
    %c0_i32_0 = arith.constant 0 : i32
    %c0_i32_1 = arith.constant 0 : i32
    return %arg0, %c0_i32, %c0_i32_0 : i32, i32, i32
  }
}

</mosaic_0001>

<bundles_post_ra>
// kernel: tpu_custom_call.1
= control target key start
LH: loop header
LB: loop body
LE: loop exit
PB: predicated region body
PF: predicated region fallthrough
CT: control target
= control target key end

     0   :  { %9 = vsyncpa [#allocation4], 0  ;;  %s334_s0 = inlined_call_operand.hbm [shape: f32[4,512], index: 0, kind: input, shape index: {}]   ;;  %s335_s1 = inlined_call_operand.hbm [shape: f32[4,512], index: 1, kind: input, shape index: {}]   ;;  %s336_s2 = inlined_call_operand.vmem [shape: f32[8,32], index: 2, kind: input, shape index: {}]   ;;  %s337_s3 = inlined_call_operand.vmem [shape: s32[8,1], index: 3, kind: input, shape index: {}]   ;;  %s338_s4 = inlined_call_operand.hbm [shape: f32[1,8,128], index: 4, kind: output, shape index: {}]  }
   0x1   :  { %10 = vsyncpa [#allocation7], 0 }
   0x2   :  { %11 = vsyncpa [#allocation5], 0  ;;  %s253_s15 = smov [#allocation3]   ;;  %s254_s17 = smov [#allocation6]  }
   0x3   :  { %s22_s16 = sshll.u32 %s253_s15, 4  ;;  %s36_s18 = sshll.u32 %s254_s17, 4  ;;  %s23_s16 = int_to_ptr.vmem [resolvable:$true] %s22_s16  ;;  %s37_s18 = int_to_ptr.vmem [resolvable:$true] %s36_s18 }
   0x4   :  { %s181_s21 = scalar_lea.hbm %s334_s0, 256 }
   0x5   :  { %p182_p0 = scmp.ne.s32.totalorder %s334_s0, %s181_s21  ;;  %p185_p1 = scmp.lt.u32.totalorder %s181_s21, %s334_s0 }
   0x7   :  { %p187_p2 = pnand %p185_p1, %p182_p0 }
   0x9   :  { %190 = shalt.err (!%p187_p2)
}
   0xa   :  { %s191_s26 = scalar_lea.vmem %s23_s16, 256  ;;  %p196_p4 = scmp.lt.s32.totalorder %s23_s16, %s23_s16 }
   0xb   :  { %p192_p3 = scmp.ne.s32.totalorder %s23_s16, %s191_s26  ;;  %p197_p5 = scmp.lt.s32.totalorder %s191_s26, %s191_s26 }
   0xd   :  { %p198_p6 = por %p197_p5, %p196_p4 }
   0xf   :  { %p199_p7 = pnand %p198_p6, %p192_p3 }
  0x11   :  { %202 = shalt.err (!%p199_p7)
}
  0x12   :  { %25 = dma.hbm_to_vmem [thread:$0]  %s334_s0, 256, %s23_s16, [#allocation4]  }
  0x13   :  { %s203_s5 = scalar_lea.hbm %s335_s1, 256 }
  0x14   :  { %p204_p8 = scmp.ne.s32.totalorder %s335_s1, %s203_s5  ;;  %p207_p9 = scmp.lt.u32.totalorder %s203_s5, %s335_s1 }
  0x16   :  { %p209_p10 = pnand %p207_p9, %p204_p8 }
  0x18   :  { %212 = shalt.err (!%p209_p10)
}
  0x19   :  { %s213_s10 = scalar_lea.vmem %s37_s18, 256  ;;  %p218_p12 = scmp.lt.s32.totalorder %s37_s18, %s37_s18 }
  0x1a   :  { %p214_p11 = scmp.ne.s32.totalorder %s37_s18, %s213_s10  ;;  %p219_p13 = scmp.lt.s32.totalorder %s213_s10, %s213_s10 }
  0x1c   :  { %p220_p0 = por %p219_p13, %p218_p12 }
  0x1e   :  { %p221_p1 = pnand %p220_p0, %p214_p11 }
  0x20   :  { %224 = shalt.err (!%p221_p1)
}
  0x21   :  { %39 = dma.hbm_to_vmem [thread:$0]  %s335_s1, 256, %s37_s18, [#allocation7]  }
  0x22   :  { %247 = dma.done.wait [#allocation4], 256  }
  0x23   :  { %248 = vsyncadd [#allocation4], 4294967040 }
  0x24   :  { %249 = dma.done.wait [#allocation7], 256  }
  0x25   :  { %250 = vsyncadd [#allocation7], 4294967040  ;;  %v255_v0 = vmov 0   ;;  %vm99_vm0 = vcmask 261120   ;;  %v97_v1 = vld [vmem:[%s336_s2] sm:$0xff]  ;;  %vm56_vm1 = vcmask 0   ;;  %v112_v10 = vlaneseq }
  0x26   :  { %176 = vset.pattern.permute.xlu0 %v255_v0  ;;  %v100_v2 = vsel %vm99_vm0, %v97_v1, -inf  ;;  %v98_v3 = vld [vmem:[%s337_s3] sm:$0xff]  ;;  %v256_v4 = vmov 0.0   ;;  %v60_v6 = vld [vmem:[#allocation6] sm:$0xff]  ;;  %v59_v13 = vld [vmem:[#allocation3 + $0x8] sm:$0xff]  ;;  %vm73_vm2 = vcmask 1043456  }
  0x27   :  { %101 = vmax.xlane.f32.xlu0 %v100_v2  ;;  %57 = vst.msk [vmem:[#allocation2] sm:$0x1] %vm56_vm1, %v256_v4  ;;  %v58_v5 = vld [vmem:[#allocation3] sm:$0xff]  ;;  %v61_v14 = vld [vmem:[#allocation6 + $0x8] sm:$0xff]  ;;  %v113_v15 = vand.u32 127, %v112_v10  ;;  %vm125_vm4 = vcmask 7168  }
  0x28   :  { %v62_v7 = vsub.f32 %v58_v5, %v60_v6  ;;  %v63_v16 = vsub.f32 %v59_v13, %v61_v14  ;;  %v142_v58 = vshrl.u32 %v112_v10, 7  ;;  %s257_s3 = smov [#allocation8]  }
  0x29   :  { %s154_s16 = sshll.u32 %s257_s3, 4  ;;  %s155_s16 = int_to_ptr.vmem [resolvable:$true] %s154_s16 }
  0x2a   :  { %v65_v11 = vmul.f32 %v62_v7, %v62_v7  ;;  %v66_v19 = vmul.f32 %v63_v16, %v63_v16  ;;  %vm143_vm5 = vcmp.eq.s32.totalorder %v142_v58, 1  ;;  %s225_s19 = scalar_lea.vmem %s155_s16, 128  ;;  %p230_p3 = scmp.lt.s32.totalorder %s155_s16, %s155_s16 }
  0x2b   :  { %p226_p2 = scmp.ne.s32.totalorder %s155_s16, %s225_s19  ;;  %p231_p4 = scmp.lt.s32.totalorder %s225_s19, %s225_s19 }
  0x2c   :  { %v69_v17 = vcombine.high %v65_v11, %v65_v11  ;;  %v74_v20 = vsel %vm73_vm2, %v65_v11, 0.0  ;;  %v70_v25 = vcombine.high %v66_v19, %v66_v19  ;;  %v77_v26 = vsel %vm73_vm2, %v66_v19, 0.0 }
  0x2d   :  { %p232_p5 = por %p231_p4, %p230_p3 }
  0x2e   :  { %v75_v21 = vsel %vm73_vm2, %v69_v17, 0.0  ;;  %v79_v31 = vsel %vm73_vm2, %v70_v25, 0.0  ;;  %v64_v47 = vld [vmem:[#allocation2] sm:$0x1] }
  0x2f   :  { %v76_v23 = vadd.f32 %v75_v21, %v74_v20  ;;  %p233_p6 = pnand %p232_p5, %p226_p2 }
  0x31   :  { %v78_v29 = vadd.f32 %v77_v26, %v76_v23 }
  0x33   :  { %v80_v32 = vadd.f32 %v79_v31, %v78_v29 }
  0x3d   :  { %115 = vperm.xlu0 %176, %v98_v3  }
  0xb4   :  { %v102_v8 = vpop.xlane.xlu0 %101 }
  0xb5   :  { %v103_v9 = vsub.f32 %v97_v1, %v102_v8 }
  0xb7   :  { %v104_v12 = vmul.f32 1.442695, %v103_v9 }
  0xb9   :  { %177 = vpow2.f32 %v104_v12 }
  0xbc   :  { %v116_v18 = vpop.permute.xlu0 %115 }
  0xbd   :  { %vm117_vm3 = vcmp.eq.s32.totalorder %v113_v15, %v116_v18 }
  0xbe   :  { %v164_v22 = vsel %vm117_vm3, 1.0, %v256_v4 }
  0xbf   :  { %v120_v24 = vmul.f32 %v164_v22, %v97_v1 }
  0xc1   :  { %v121_v30 = vsel %vm99_vm0, %v120_v24, 0.0 }
  0xc3   :  { %v178_v27 = vpop.eup %177 }
  0xc4   :  { %v106_v28 = vsel %vm99_vm0, %v178_v27, 0.0 }
  0xc5   :  { %107 = vadd.xlane.f32.xlu1 %v106_v28 }
  0xc9   :  { %122 = vadd.xlane.f32.xlu1 %v121_v30 }
  0xcd   :  { %81 = vadd.xlane.f32.xlu1 %v80_v32 }
 0x152   :  { %v108_v33 = vpop.xlane.xlu1 %107 }
 0x153   :  { %179 = vlog2.f32 %v108_v33 }
 0x156   :  { %v123_v34 = vpop.xlane.xlu1 %122 }
 0x15a   :  { %v82_v35 = vpop.xlane.xlu1 %81 }
 0x15b   :  { %v83_v36 = vrot.slane %v82_v35, 4 }
 0x15d   :  { %v180_v37 = vpop.eup %179  ;;  %v84_v38 = vadd.f32 %v83_v36, %v82_v35 }
 0x15e   :  { %v110_v39 = vmul.f32 0.6931472, %v180_v37 }
 0x15f   :  { %v85_v40 = vrot.slane %v84_v38, 2 }
 0x160   :  { %v111_v41 = vadd.f32 %v110_v39, %v102_v8 }
 0x161   :  { %v86_v42 = vadd.f32 %v85_v40, %v84_v38 }
 0x162   :  { %v124_v43 = vsub.f32 %v111_v41, %v123_v34 }
 0x163   :  { %v87_v44 = vrot.slane %v86_v42, 1 }
 0x164   :  { %v126_v45 = vsel %vm125_vm4, %v124_v43, 0.0 }
 0x165   :  { %127 = vadd.xlane.f32.xlu1 %v126_v45  ;;  %v88_v46 = vadd.f32 %v87_v44, %v86_v42 }
 0x167   :  { %165 = vpush %v88_v46 }
 0x198   :  { %s166_s1 = spop %165 }
 0x199   :  { %v90_v48 = vstv %s166_s1 }
 0x19a   :  { %v91_v49 = vadd.f32 %v90_v48, %v64_v47 }
 0x19c   :  { %93 = vst.msk [vmem:[#allocation2] sm:$0x1] %vm56_vm1, %v91_v49 }
 0x1a3   :  { %v139_v57 = vld [vmem:[#allocation2] sm:$0x1] }
 0x1f2   :  { %v128_v50 = vpop.xlane.xlu1 %127 }
 0x1f3   :  { %v129_v51 = vrot.slane %v128_v50, 4 }
 0x1f5   :  { %v130_v52 = vadd.f32 %v129_v51, %v128_v50 }
 0x1f7   :  { %v131_v53 = vrot.slane %v130_v52, 2 }
 0x1f9   :  { %v132_v54 = vadd.f32 %v131_v53, %v130_v52 }
 0x1fb   :  { %v133_v55 = vrot.slane %v132_v54, 1 }
 0x1fd   :  { %v134_v56 = vadd.f32 %v133_v55, %v132_v54 }
 0x1ff   :  { %167 = vpush %v134_v56 }
 0x200   :  { %169 = vpush %v139_v57 }
 0x230   :  { %s168_s2 = spop %167 }
 0x231   :  { %s138_s17 = smul.f32 0.125, %s168_s2  ;;  %s170_s18 = spop %169 }
 0x232   :  { %v145_v60 = vstv %s170_s18 }
 0x233   :  { %v144_v59 = vstv %s138_s17 }
 0x234   :  { %v146_v61 = vsel %vm143_vm5, %v144_v59, %v145_v60 }
 0x235   :  { %147 = vst [vmem:[#allocation8] sm:$0xff] %v146_v61 }
 0x236   :  { %236 = shalt.err (!%p233_p6)
}
 0x237   :  { %s237_s22 = scalar_lea.hbm %s338_s4, 128 }
 0x238   :  { %p238_p7 = scmp.ne.s32.totalorder %s338_s4, %s237_s22  ;;  %p241_p8 = scmp.lt.u32.totalorder %s237_s22, %s338_s4 }
 0x23a   :  { %p243_p9 = pnand %p241_p8, %p238_p7 }
 0x23c   :  { %246 = shalt.err (!%p243_p9)
}
 0x23d   :  { %157 = dma.vmem_to_hbm [thread:$0]  %s155_s16, 128, %s338_s4, [#allocation5]  }
 0x23e   :  { %251 = dma.done.wait [#allocation5], 128  }
 0x23f   :  { %252 = vsyncadd [#allocation5], 4294967168 }
 0x240   :  { %161 = vsyncpa [#allocation4], 1 }
 0x241   :  { %162 = vsyncpa [#allocation7], 1 }
 0x242   :  { %163 = vsyncpa [#allocation5], 1 }

</bundles_post_ra>
